<compile_context>
chip_gen: v6e
topology: v6e:2x2x1
jax: 0.10.0
libtpu: 0.0.40
codegen_flags: <defaults>
</compile_context>

<pallas_src>
import functools

import jax
import jax.numpy as jnp
from jax import lax
from jax.experimental import pallas as pl
from jax.experimental.pallas import tpu as pltpu

MARGIN = 0.2  # module default


def _round_up(x, m):
    return ((x + m - 1) // m) * m


# ----------------------------------------------------------------------------
# Fused kernel: squared pdist tile + hard mining + per-row triplet loss.
#   grid = (rows/TM, cols/TN); the column axis is the reduction ("arbitrary").
# ----------------------------------------------------------------------------
def _fused_triplet_kernel(xi_ref, xj_ref, sqj_ref, li_ref, lj_ref,
                          loss_ref, valid_ref,
                          dpos_acc, dneg_acc,
                          *, n, margin):
    i = pl.program_id(0)
    j = pl.program_id(1)
    nj = pl.num_programs(1)
    tm = xi_ref.shape[0]
    tn = xj_ref.shape[0]

    @pl.when(j == 0)
    def _init():
        dpos_acc[...] = jnp.full_like(dpos_acc, -jnp.inf)
        dneg_acc[...] = jnp.full_like(dneg_acc, jnp.inf)

    xi = xi_ref[...]            # (TM, D) native dtype -> MXU
    xj = xj_ref[...]            # (TN, D) native dtype -> MXU
    # A . B^T without an explicit transpose: contract last dim of both.
    gram = lax.dot_general(xi, xj, (((1,), (1,)), ((), ())),
                           preferred_element_type=jnp.float32)        # (TM, TN)
    xif = xi.astype(jnp.float32)
    sq_i = jnp.sum(xif * xif, axis=-1, keepdims=True)                 # (TM, 1)
    # ||x_i - x_j||^2 = ||x_i||^2 + ||x_j||^2 - 2 <x_i, x_j>   (clamped >= 0)
    dist = jnp.maximum(sq_i + sqj_ref[...] - 2.0 * gram, 0.0)         # (TM, TN)

    row_ids = i * tm + lax.broadcasted_iota(jnp.int32, (tm, tn), 0)
    col_ids = j * tn + lax.broadcasted_iota(jnp.int32, (tm, tn), 1)
    same = li_ref[...] == lj_ref[...]                                 # (TM, TN)
    in_range = col_ids < n                                            # pad mask
    pos_mask = same & (row_ids != col_ids) & in_range
    neg_mask = jnp.logical_not(same) & in_range

    minus_inf = jnp.float32(-jnp.inf)
    plus_inf = jnp.float32(jnp.inf)
    # hardest positive = farthest same-label; hardest negative = closest other.
    dpos_acc[...] = jnp.maximum(
        dpos_acc[...],
        jnp.max(jnp.where(pos_mask, dist, minus_inf), axis=1, keepdims=True))
    dneg_acc[...] = jnp.minimum(
        dneg_acc[...],
        jnp.min(jnp.where(neg_mask, dist, plus_inf), axis=1, keepdims=True))

    @pl.when(j == nj - 1)
    def _finalize():
        dpos = dpos_acc[...]
        dneg = dneg_acc[...]
        has_pos = dpos > minus_inf
        has_neg = dneg < plus_inf
        # TODO(synk): torch's pairwise_distance adds eps=1e-6 elementwise inside
        # the norm (||a - p + eps||_2); the fused path uses sqrt(||a - p||^2),
        # an O(1e-6) difference in the forward value.
        d_ap = jnp.sqrt(jnp.maximum(dpos, 0.0))
        d_an = jnp.sqrt(jnp.maximum(dneg, 0.0))
        loss = jnp.maximum(d_ap - d_an + margin, 0.0)
        valid = has_pos & has_neg
        loss_ref[...] = jnp.where(valid, loss, 0.0)
        valid_ref[...] = valid.astype(jnp.float32)


# ----------------------------------------------------------------------------
# _Triplet.forward equivalent (reduce=True, size_average=True -> mean)
# ----------------------------------------------------------------------------
@jax.jit
def triplet_forward(embeddings, labels):
    n, dim = embeddings.shape
    # MXU-native tile (256 for v6e/v7x), clipped for tiny inputs.
    # TODO(synk): on v5e a 128 tile matches the 4x128^2 MXU better.
    tile = min(256, _round_up(n, 8))
    n_pad = _round_up(n, tile)

    x = embeddings
    lab = labels.astype(jnp.int32)
    if n_pad != n:
        x = jnp.pad(x, ((0, n_pad - n), (0, 0)))
        lab = jnp.pad(lab, (0, n_pad - n), constant_values=-1)

    # Lane-dense row of column squared-norms (avoids any in-kernel transpose).
    xf = x.astype(jnp.float32)
    sq_row = jnp.sum(xf * xf, axis=-1)[None, :]          # (1, n_pad)
    lab_rows = lab[:, None]                              # (n_pad, 1)
    lab_cols = lab[None, :]                              # (1, n_pad)

    grid = (n_pad // tile, n_pad // tile)
    itemsize = jnp.dtype(x.dtype).itemsize
    cost = pl.CostEstimate(
        flops=2 * n_pad * n_pad * dim,
        transcendentals=2 * n_pad,
        bytes_accessed=grid[0] * grid[1] * 2 * tile * dim * itemsize
                       + 5 * n_pad * 4,
    )

    kernel = functools.partial(_fused_triplet_kernel, n=n, margin=MARGIN)
    loss_rows, valid = pl.pallas_call(
        kernel,
        out_shape=(jax.ShapeDtypeStruct((n_pad, 1), jnp.float32),
                   jax.ShapeDtypeStruct((n_pad, 1), jnp.float32)),
        grid_spec=pltpu.PrefetchScalarGridSpec(
            num_scalar_prefetch=0,
            grid=grid,
            in_specs=[
                pl.BlockSpec((tile, dim), lambda i, j: (i, 0)),  # anchor rows
                pl.BlockSpec((tile, dim), lambda i, j: (j, 0)),  # candidate rows
                pl.BlockSpec((1, tile), lambda i, j: (0, j)),    # ||x_j||^2 row
                pl.BlockSpec((tile, 1), lambda i, j: (i, 0)),    # labels (rows)
                pl.BlockSpec((1, tile), lambda i, j: (0, j)),    # labels (cols)
            ],
            out_specs=[
                pl.BlockSpec((tile, 1), lambda i, j: (i, 0)),
                pl.BlockSpec((tile, 1), lambda i, j: (i, 0)),
            ],
            scratch_shapes=[pltpu.VMEM((tile, 1), jnp.float32),
                            pltpu.VMEM((tile, 1), jnp.float32)],
        ),
        compiler_params=pltpu.CompilerParams(
            dimension_semantics=("parallel", "arbitrary")),
        cost_estimate=cost,
    )(x, x, sq_row, lab_rows, lab_cols)

    loss_rows = loss_rows[:n, 0]
    valid = valid[:n, 0]
    # Mean over triplets the (hard-mining) sampler produced; anchors with no
    # valid positive or negative are excluded rather than using a bogus pair.
    count = jnp.maximum(jnp.sum(valid), 1.0)
    return jnp.sum(loss_rows) / count


# ----------------------------------------------------------------------------
# Pure-JAX reference (same hard-mining semantics) for a sanity check.
# ----------------------------------------------------------------------------
def _reference(embeddings, labels, margin=MARGIN):
    e = embeddings.astype(jnp.float32)
    d2 = jnp.sum((e[:, None, :] - e[None, :, :]) ** 2, axis=-1)
    same = labels[:, None] == labels[None, :]
    eye = jnp.eye(labels.shape[0], dtype=bool)
    dpos = jnp.max(jnp.where(same & ~eye, d2, -jnp.inf), axis=1)
    dneg = jnp.min(jnp.where(~same, d2, jnp.inf), axis=1)
    loss = jnp.maximum(jnp.sqrt(jnp.maximum(dpos, 0.0))
                       - jnp.sqrt(jnp.maximum(dneg, 0.0)) + margin, 0.0)
    return jnp.mean(loss)


if __name__ == "__main__":
    key = jax.random.PRNGKey(0)
    N, D = 8, 32
    embeddings = jax.random.normal(key, (N, D), dtype=jnp.float32)
    labels = jnp.array([0, 0, 1, 1, 2, 2, 3, 3], dtype=jnp.int32)

    loss = triplet_forward(embeddings, labels)
    jax.block_until_ready(loss)
    ref = _reference(embeddings, labels)
    assert loss.shape == () and bool(jnp.isfinite(loss))
    assert jnp.allclose(loss, ref, rtol=1e-3, atol=1e-3), (loss, ref)

    # Second shape exercises the padding / in_range masking path (N % 8 != 0).
    k2 = jax.random.PRNGKey(1)
    emb2 = jax.random.normal(k2, (10, 48), dtype=jnp.float32)
    lab2 = jnp.array([0, 0, 0, 1, 1, 2, 2, 3, 3, 3], dtype=jnp.int32)
    loss2 = triplet_forward(emb2, lab2)
    jax.block_until_ready(loss2)
    ref2 = _reference(emb2, lab2)
    assert loss2.shape == () and bool(jnp.isfinite(loss2))
    assert jnp.allclose(loss2, ref2, rtol=1e-3, atol=1e-3), (loss2, ref2)

    print("KERNEL_OK")
</pallas_src>

<mosaic_0001>
module attributes {stable_mosaic.version = 11 : i64} {
  func.func @_fused_triplet_kernel(%arg0: i32, %arg1: i32, %arg2: memref<8x32xf32, #tpu.memory_space<vmem>>, %arg3: memref<8x32xf32, #tpu.memory_space<vmem>>, %arg4: memref<1x8xf32, #tpu.memory_space<vmem>>, %arg5: memref<8x1xi32, #tpu.memory_space<vmem>>, %arg6: memref<1x8xi32, #tpu.memory_space<vmem>>, %arg7: memref<8x1xf32, #tpu.memory_space<vmem>>, %arg8: memref<8x1xf32, #tpu.memory_space<vmem>>, %arg9: memref<8x1xf32, #tpu.memory_space<vmem>>, %arg10: memref<8x1xf32, #tpu.memory_space<vmem>>) attributes {dimension_semantics = [#tpu.dimension_semantics<parallel>, #tpu.dimension_semantics<arbitrary>], iteration_bounds = array<i64: 1, 1>, scalar_prefetch = 0 : i64, scratch_operands = 2 : i64, tpu.core_type = #tpu.core_type<tc>, window_params = [{transform_indices = @transform_0, window_bounds = array<i64: 8, 32>}, {transform_indices = @transform_1, window_bounds = array<i64: 8, 32>}, {transform_indices = @transform_2, window_bounds = array<i64: 1, 8>}, {transform_indices = @transform_3, window_bounds = array<i64: 8, 1>}, {transform_indices = @transform_4, window_bounds = array<i64: 1, 8>}, {transform_indices = @transform_5, window_bounds = array<i64: 8, 1>}, {transform_indices = @transform_6, window_bounds = array<i64: 8, 1>}]} {
    %c0_i32 = arith.constant 0 : i32
    %0 = arith.cmpi eq, %arg1, %c0_i32 : i32
    %1 = arith.extui %0 : i1 to i32
    %c0_i32_0 = arith.constant 0 : i32
    %2 = arith.cmpi ne, %1, %c0_i32_0 : i32
    scf.if %2 {
      %cst_32 = arith.constant 0xFF800000 : f32
      %55 = vector.broadcast %cst_32 : f32 to vector<8x1xf32>
      %c0_33 = arith.constant 0 : index
      %c0_34 = arith.constant 0 : index
      %56 = vector.load %arg9[%c0_33, %c0_34] : memref<8x1xf32, #tpu.memory_space<vmem>>, vector<8x1xf32>
      tpu.vector_store %arg9[%c0_33, %c0_34], %55 {strides = array<i32>} : memref<8x1xf32, #tpu.memory_space<vmem>>, vector<8x1xf32>,
      %cst_35 = arith.constant 0x7F800000 : f32
      %57 = vector.broadcast %cst_35 : f32 to vector<8x1xf32>
      %c0_36 = arith.constant 0 : index
      %c0_37 = arith.constant 0 : index
      %58 = vector.load %arg10[%c0_36, %c0_37] : memref<8x1xf32, #tpu.memory_space<vmem>>, vector<8x1xf32>
      tpu.vector_store %arg10[%c0_36, %c0_37], %57 {strides = array<i32>} : memref<8x1xf32, #tpu.memory_space<vmem>>, vector<8x1xf32>,
    } else {
    }
    %c0 = arith.constant 0 : index
    %c0_1 = arith.constant 0 : index
    %3 = vector.load %arg2[%c0, %c0_1] : memref<8x32xf32, #tpu.memory_space<vmem>>, vector<8x32xf32>
    %c0_2 = arith.constant 0 : index
    %c0_3 = arith.constant 0 : index
    %4 = vector.load %arg3[%c0_2, %c0_3] : memref<8x32xf32, #tpu.memory_space<vmem>>, vector<8x32xf32>
    %cst = arith.constant dense<0.000000e+00> : vector<8x8xf32>
    %5 = tpu.matmul %3, %4, %cst {dimension_numbers = #tpu.dot_dimension_numbers<[1], [1], [0], [0], [0, 0, 1, 0], [], []>} : vector<8x32xf32>, vector<8x32xf32>, vector<8x8xf32> -> vector<8x8xf32>
    %6 = arith.mulf %3, %3 : vector<8x32xf32>
    %cst_4 = arith.constant dense<0.000000e+00> : vector<8xf32>
    %7 = vector.multi_reduction <add>, %6, %cst_4 [1] : vector<8x32xf32> to vector<8xf32>
    %8 = vector.shape_cast %7 : vector<8xf32> to vector<8x1xf32>
    %c0_5 = arith.constant 0 : index
    %c0_6 = arith.constant 0 : index
    %9 = vector.load %arg4[%c0_5, %c0_6] : memref<1x8xf32, #tpu.memory_space<vmem>>, vector<1x8xf32>
    %10 = vector.broadcast %8 : vector<8x1xf32> to vector<8x8xf32>
    %11 = vector.broadcast %9 : vector<1x8xf32> to vector<8x8xf32>
    %12 = arith.addf %10, %11 : vector<8x8xf32>
    %cst_7 = arith.constant 2.000000e+00 : f32
    %13 = vector.broadcast %cst_7 : f32 to vector<8x8xf32>
    %14 = arith.mulf %13, %5 : vector<8x8xf32>
    %15 = arith.subf %12, %14 : vector<8x8xf32>
    %cst_8 = arith.constant 0.000000e+00 : f32
    %16 = vector.broadcast %cst_8 : f32 to vector<8x8xf32>
    %17 = arith.maximumf %15, %16 : vector<8x8xf32>
    %c8_i32 = arith.constant 8 : i32
    %18 = arith.muli %arg0, %c8_i32 : i32
    %19 = tpu.iota {dimensions = array<i32: 0>} : vector<8x8xi32>
    %20 = vector.broadcast %18 : i32 to vector<8x8xi32>
    %21 = arith.addi %20, %19 : vector<8x8xi32>
    %c8_i32_9 = arith.constant 8 : i32
    %22 = arith.muli %arg1, %c8_i32_9 : i32
    %23 = tpu.iota {dimensions = array<i32: 1>} : vector<8x8xi32>
    %24 = vector.broadcast %22 : i32 to vector<8x8xi32>
    %25 = arith.addi %24, %23 : vector<8x8xi32>
    %c0_10 = arith.constant 0 : index
    %c0_11 = arith.constant 0 : index
    %26 = vector.load %arg5[%c0_10, %c0_11] : memref<8x1xi32, #tpu.memory_space<vmem>>, vector<8x1xi32>
    %c0_12 = arith.constant 0 : index
    %c0_13 = arith.constant 0 : index
    %27 = vector.load %arg6[%c0_12, %c0_13] : memref<1x8xi32, #tpu.memory_space<vmem>>, vector<1x8xi32>
    %28 = vector.broadcast %26 : vector<8x1xi32> to vector<8x8xi32>
    %29 = vector.broadcast %27 : vector<1x8xi32> to vector<8x8xi32>
    %30 = arith.cmpi eq, %28, %29 : vector<8x8xi32>
    %c8_i32_14 = arith.constant 8 : i32
    %31 = vector.broadcast %c8_i32_14 : i32 to vector<8x8xi32>
    %32 = arith.cmpi slt, %25, %31 : vector<8x8xi32>
    %33 = arith.cmpi ne, %21, %25 : vector<8x8xi32>
    %34 = arith.andi %30, %33 : vector<8x8xi1>
    %35 = arith.andi %34, %32 : vector<8x8xi1>
    %cst_15 = arith.constant dense<true> : vector<8x8xi1>
    %36 = arith.xori %30, %cst_15 : vector<8x8xi1>
    %37 = arith.andi %36, %32 : vector<8x8xi1>
    %c0_16 = arith.constant 0 : index
    %c0_17 = arith.constant 0 : index
    %38 = vector.load %arg9[%c0_16, %c0_17] : memref<8x1xf32, #tpu.memory_space<vmem>>, vector<8x1xf32>
    %cst_18 = arith.constant 0xFF800000 : f32
    %39 = vector.broadcast %cst_18 : f32 to vector<8x8xf32>
    %40 = arith.select %35, %17, %39 : vector<8x8xi1>, vector<8x8xf32>
    %cst_19 = arith.constant dense<0xFF800000> : vector<8xf32>
    %41 = vector.multi_reduction <maximumf>, %40, %cst_19 [1] : vector<8x8xf32> to vector<8xf32>
    %42 = vector.shape_cast %41 : vector<8xf32> to vector<8x1xf32>
    %43 = arith.maximumf %38, %42 : vector<8x1xf32>
    %c0_20 = arith.constant 0 : index
    %c0_21 = arith.constant 0 : index
    %44 = vector.load %arg9[%c0_20, %c0_21] : memref<8x1xf32, #tpu.memory_space<vmem>>, vector<8x1xf32>
    tpu.vector_store %arg9[%c0_20, %c0_21], %43 {strides = array<i32>} : memref<8x1xf32, #tpu.memory_space<vmem>>, vector<8x1xf32>,
    %c0_22 = arith.constant 0 : index
    %c0_23 = arith.constant 0 : index
    %45 = vector.load %arg10[%c0_22, %c0_23] : memref<8x1xf32, #tpu.memory_space<vmem>>, vector<8x1xf32>
    %cst_24 = arith.constant 0x7F800000 : f32
    %46 = vector.broadcast %cst_24 : f32 to vector<8x8xf32>
    %47 = arith.select %37, %17, %46 : vector<8x8xi1>, vector<8x8xf32>
    %cst_25 = arith.constant dense<0x7F800000> : vector<8xf32>
    %48 = vector.multi_reduction <minimumf>, %47, %cst_25 [1] : vector<8x8xf32> to vector<8xf32>
    %49 = vector.shape_cast %48 : vector<8xf32> to vector<8x1xf32>
    %50 = arith.minimumf %45, %49 : vector<8x1xf32>
    %c0_26 = arith.constant 0 : index
    %c0_27 = arith.constant 0 : index
    %51 = vector.load %arg10[%c0_26, %c0_27] : memref<8x1xf32, #tpu.memory_space<vmem>>, vector<8x1xf32>
    tpu.vector_store %arg10[%c0_26, %c0_27], %50 {strides = array<i32>} : memref<8x1xf32, #tpu.memory_space<vmem>>, vector<8x1xf32>,
    %c0_i32_28 = arith.constant 0 : i32
    %52 = arith.cmpi eq, %arg1, %c0_i32_28 : i32
    %53 = arith.extui %52 : i1 to i32
    %cst_29 = arith.constant 0xFF800000 : f32
    %cst_30 = arith.constant 0x7F800000 : f32
    %c0_i32_31 = arith.constant 0 : i32
    %54 = arith.cmpi ne, %53, %c0_i32_31 : i32
    scf.if %54 {
      %c0_32 = arith.constant 0 : index
      %c0_33 = arith.constant 0 : index
      %55 = vector.load %arg9[%c0_32, %c0_33] : memref<8x1xf32, #tpu.memory_space<vmem>>, vector<8x1xf32>
      %c0_34 = arith.constant 0 : index
      %c0_35 = arith.constant 0 : index
      %56 = vector.load %arg10[%c0_34, %c0_35] : memref<8x1xf32, #tpu.memory_space<vmem>>, vector<8x1xf32>
      %57 = vector.broadcast %cst_29 : f32 to vector<8x1xf32>
      %58 = arith.cmpf ogt, %55, %57 : vector<8x1xf32>
      %59 = vector.broadcast %cst_30 : f32 to vector<8x1xf32>
      %60 = arith.cmpf olt, %56, %59 : vector<8x1xf32>
      %cst_36 = arith.constant 0.000000e+00 : f32
      %61 = vector.broadcast %cst_36 : f32 to vector<8x1xf32>
      %62 = arith.maximumf %55, %61 : vector<8x1xf32>
      %63 = math.sqrt %62 : vector<8x1xf32>
      %cst_37 = arith.constant 0.000000e+00 : f32
      %64 = vector.broadcast %cst_37 : f32 to vector<8x1xf32>
      %65 = arith.maximumf %56, %64 : vector<8x1xf32>
      %66 = math.sqrt %65 : vector<8x1xf32>
      %67 = arith.subf %63, %66 : vector<8x1xf32>
      %cst_38 = arith.constant 2.000000e-01 : f32
      %68 = vector.broadcast %cst_38 : f32 to vector<8x1xf32>
      %69 = arith.addf %67, %68 : vector<8x1xf32>
      %cst_39 = arith.constant 0.000000e+00 : f32
      %70 = vector.broadcast %cst_39 : f32 to vector<8x1xf32>
      %71 = arith.maximumf %69, %70 : vector<8x1xf32>
      %72 = arith.andi %58, %60 : vector<8x1xi1>
      %cst_40 = arith.constant 0.000000e+00 : f32
      %73 = vector.broadcast %cst_40 : f32 to vector<8x1xf32>
      %74 = arith.select %72, %71, %73 : vector<8x1xi1>, vector<8x1xf32>
      %c0_41 = arith.constant 0 : index
      %c0_42 = arith.constant 0 : index
      %75 = vector.load %arg7[%c0_41, %c0_42] : memref<8x1xf32, #tpu.memory_space<vmem>>, vector<8x1xf32>
      tpu.vector_store %arg7[%c0_41, %c0_42], %74 {strides = array<i32>} : memref<8x1xf32, #tpu.memory_space<vmem>>, vector<8x1xf32>,
      %76 = arith.extui %72 : vector<8x1xi1> to vector<8x1xi32>
      %77 = arith.sitofp %76 : vector<8x1xi32> to vector<8x1xf32>
      %c0_43 = arith.constant 0 : index
      %c0_44 = arith.constant 0 : index
      %78 = vector.load %arg8[%c0_43, %c0_44] : memref<8x1xf32, #tpu.memory_space<vmem>>, vector<8x1xf32>
      tpu.vector_store %arg8[%c0_43, %c0_44], %77 {strides = array<i32>} : memref<8x1xf32, #tpu.memory_space<vmem>>, vector<8x1xf32>,
    } else {
    }
    return
  }
  func.func @transform_0(%arg0: i32, %arg1: i32) -> (i32, i32) {
    %c0_i32 = arith.constant 0 : i32
    %c0_i32_0 = arith.constant 0 : i32
    return %arg0, %c0_i32 : i32, i32
  }
  func.func @transform_1(%arg0: i32, %arg1: i32) -> (i32, i32) {
    %c0_i32 = arith.constant 0 : i32
    %c0_i32_0 = arith.constant 0 : i32
    return %arg1, %c0_i32 : i32, i32
  }
  func.func @transform_2(%arg0: i32, %arg1: i32) -> (i32, i32) {
    %c0_i32 = arith.constant 0 : i32
    %c0_i32_0 = arith.constant 0 : i32
    return %c0_i32, %arg1 : i32, i32
  }
  func.func @transform_3(%arg0: i32, %arg1: i32) -> (i32, i32) {
    %c0_i32 = arith.constant 0 : i32
    %c0_i32_0 = arith.constant 0 : i32
    return %arg0, %c0_i32 : i32, i32
  }
  func.func @transform_4(%arg0: i32, %arg1: i32) -> (i32, i32) {
    %c0_i32 = arith.constant 0 : i32
    %c0_i32_0 = arith.constant 0 : i32
    return %c0_i32, %arg1 : i32, i32
  }
  func.func @transform_5(%arg0: i32, %arg1: i32) -> (i32, i32) {
    %c0_i32 = arith.constant 0 : i32
    %c0_i32_0 = arith.constant 0 : i32
    return %arg0, %c0_i32 : i32, i32
  }
  func.func @transform_6(%arg0: i32, %arg1: i32) -> (i32, i32) {
    %c0_i32 = arith.constant 0 : i32
    %c0_i32_0 = arith.constant 0 : i32
    return %arg0, %c0_i32 : i32, i32
  }
}

</mosaic_0001>

<bundles_post_ra>
// kernel: triplet_forward.1
= control target key start
LH: loop header
LB: loop body
LE: loop exit
PB: predicated region body
PF: predicated region fallthrough
CT: control target
= control target key end

     0   :  { %vm31_vm0 = vcmask 261120   ;;  %v228_v0 = vmov 0.0   ;;  %vm229_vm1 = vmmov 0   ;;  %v230_v4 = vmov 0   ;;  %s307_s1 = inlined_call_operand.vmem [shape: f32[8,32], index: 1, kind: input, shape index: {}, may-alias: {0,1}]   ;;  %s308_s0 = inlined_call_operand.vmem [shape: f32[8,32], index: 0, kind: input, shape index: {}, may-alias: {0,1}]   ;;  %s309_s3 = inlined_call_operand.vmem [shape: s32[8,1], index: 3, kind: input, shape index: {}]   ;;  %s310_s4 = inlined_call_operand.vmem [shape: s32[1,8], index: 4, kind: input, shape index: {}]   ;;  %s311_s2 = inlined_call_operand.vmem [shape: f32[1,8], index: 2, kind: input, shape index: {}]   ;;  %s312_s6 = inlined_call_operand.vmem [shape: f32[8,1], index: 6, kind: output, shape index: {1}]   ;;  %s313_s5 = inlined_call_operand.vmem [shape: f32[8,1], index: 5, kind: output, shape index: {0}]  }
   0x1   :  { %212 = vmatprep.subr.mxu0 %v228_v0  ;;  %v30_v1 = vld [vmem:[%s307_s1] sm:$0xff]  ;;  %214 = vmatprep.mubr.msk.f32.mxu0 %vm229_vm1, %v228_v0  ;;  %vm26_vm2 = vcmask 7168   ;;  %v231_v7 = vmov -inf   ;;  %v124_v8 = vlaneseq  ;;  %vm232_vm7 = vmmov 1  }
   0x2   :  { %v29_v2 = vld [vmem:[%s308_s0] sm:$0xff]  ;;  %213 = vmatpush3.xpose.msk.msra.mxu0 %vm31_vm0, %v30_v1  ;;  %223 = vset.pattern.permute.xlu0 %v230_v4  ;;  %27 = vst.msk [vmem:[#allocation2] sm:$0xff] %vm26_vm2, %v231_v7  ;;  %vm151_vm10 = vcmask 64512   ;;  %v233_v25 = vmov inf  }
   0x3   :  { %v108_v3 = vmul.f32 %v29_v2, %v29_v2  ;;  %v133_v6 = vld [vmem:[%s309_s3] sm:$0xff]  ;;  %v125_v10 = vshrl.u32 %v124_v8, 7  ;;  %v130_v11 = vand.u32 127, %v124_v8  ;;  %28 = vst.msk [vmem:[#allocation3] sm:$0xff] %vm26_vm2, %v233_v25 }
   0x4   :  { %v208_v12 = vld [vmem:[%s310_s4] ss:$0 sm:$0xff] }
   0x5   :  { %v109_v5 = vsel %vm31_vm0, %v108_v3, 0.0  ;;  %215 = vmatmul.mubr.msk.f32.vlgmr.msra.gmra.mxu0 %vm31_vm0, %v29_v2  ;;  %v207_v14 = vld [vmem:[%s311_s2] ss:$0 sm:$0xff]  ;;  %vm144_vm3 = vcmp.ne.s32.totalorder %v125_v10, %v130_v11  ;;  %vm143_vm6 = vcmp.lt.s32.totalorder %v130_v11, 8 }
   0x6   :  { %110 = vadd.xlane.f32.xlu0 %v109_v5 }
   0x9   :  { %v149_v26 = vld [vmem:[#allocation2] sm:$0xff] }
   0xa   :  { %v158_v29 = vld [vmem:[#allocation3] sm:$0xff] }
  0x1c   :  { %136 = vperm.xlu0 %223, %v133_v6  }
  0x8f   :  { %v111_v9 = vpop.xlane.xlu0 %110 }
  0x90   :  { %v119_v16 = vadd.f32 %v207_v14, %v111_v9 }
  0x97   :  { %v137_v13 = vpop.permute.xlu0 %136 }
  0x98   :  { %vm142_vm4 = vcmp.eq.s32.totalorder %v137_v13, %v208_v12 }
  0x99   :  { %vm145_vm5 = vmand %vm142_vm4, %vm144_vm3 }
  0x9a   :  { %vm147_vm8 = vmxor %vm142_vm4, %vm232_vm7 }
  0x9b   :  { %vm146_vm9 = vmand %vm145_vm5, %vm143_vm6 }
  0x9c   :  { %vm148_vm11 = vmand %vm147_vm8, %vm143_vm6 }
  0xc5   :  { %v104_v15 = vpop.f32.mrf.mxu0 }
  0xc6   :  { %v120_v17 = vmul.f32 2.0, %v104_v15 }
  0xc7   :  { %v216_v18 = vpop.f32.mrf.mxu0 }
  0xc8   :  { %v121_v19 = vsub.f32 %v119_v16, %v120_v17 }
  0xca   :  { %v122_v20 = vmax.f32 %v121_v19, 0.0 }
  0xcc   :  { %v150_v21 = vsel %vm146_vm9, %v122_v20, -inf  ;;  %v159_v23 = vsel %vm148_vm11, %v122_v20, inf }
  0xcd   :  { %v152_v22 = vsel %vm151_vm10, %v150_v21, -inf  ;;  %v160_v24 = vsel %vm151_vm10, %v159_v23, inf }
  0xce   :  { %153 = vmax.xlane.f32.xlu1 %v152_v22 }
  0xd2   :  { %161 = vmin.xlane.f32.xlu1 %v160_v24 }
 0x157   :  { %v154_v27 = vpop.xlane.xlu1 %153 }
 0x158   :  { %v155_v28 = vmax.f32 %v149_v26, %v154_v27 }
 0x15a   :  { %157 = vst.msk [vmem:[#allocation2] sm:$0xff] %vm26_vm2, %v155_v28 }
 0x15b   :  { %v162_v30 = vpop.xlane.xlu1 %161 }
 0x15c   :  { %v163_v31 = vmin.f32 %v158_v29, %v162_v30 }
 0x15e   :  { %164 = vst.msk [vmem:[#allocation3] sm:$0xff] %vm26_vm2, %v163_v31 }
 0x161   :  { %v168_v32 = vld [vmem:[#allocation2] sm:$0xff] }
 0x162   :  { %v172_v33 = vmax.f32 %v168_v32, 0.0  ;;  %vm170_vm12 = vcmp.gt.f32.partialorder %v168_v32, -inf }
 0x164   :  { %224 = vrsqrt.f32 %v172_v33  ;;  %vm175_vm15 = vcmp.eq.f32.partialorder %v172_v33, inf  ;;  %v178_v43 = vand.u32 2147483648, %v172_v33  ;;  %vm177_vm1 = vcmp.eq.f32.partialorder %v172_v33, 0.0 }
 0x165   :  { %v169_v34 = vld [vmem:[#allocation3] sm:$0xff] }
 0x166   :  { %vm171_vm13 = vcmp.lt.f32.partialorder %v169_v34, inf  ;;  %v180_v35 = vmax.f32 %v169_v34, 0.0 }
 0x167   :  { %vm290_vm14 = vmand %vm170_vm12, %vm171_vm13 }
 0x168   :  { %226 = vrsqrt.f32 %v180_v35  ;;  %v209_v37 = vsel %vm290_vm14, 1.0, %v228_v0  ;;  %vm183_vm0 = vcmp.eq.f32.partialorder %v180_v35, inf  ;;  %v186_v44 = vand.u32 2147483648, %v180_v35 }
 0x169   :  { %196 = vst.msk [vmem:[%s312_s6] sm:$0xff] %vm26_vm2, %v209_v37  ;;  %vm185_vm3 = vcmp.eq.f32.partialorder %v180_v35, 0.0 }
 0x171   :  { %v225_v38 = vpop.eup %224 }
 0x172   :  { %v174_v39 = vmul.f32 %v225_v38, %v172_v33 }
 0x174   :  { %v176_v41 = vsel %vm175_vm15, %v172_v33, %v174_v39 }
 0x175   :  { %v227_v40 = vpop.eup %226  ;;  %v179_v46 = vsel %vm177_vm1, %v178_v43, %v176_v41 }
 0x176   :  { %v182_v42 = vmul.f32 %v227_v40, %v180_v35 }
 0x178   :  { %v184_v45 = vsel %vm183_vm0, %v180_v35, %v182_v42 }
 0x179   :  { %v187_v47 = vsel %vm185_vm3, %v186_v44, %v184_v45 }
 0x17a   :  { %v188_v48 = vsub.f32 %v179_v46, %v187_v47 }
 0x17c   :  { %v189_v49 = vadd.f32 0.2, %v188_v48 }
 0x17e   :  { %v190_v50 = vmax.f32 %v189_v49, 0.0 }
 0x180   :  { %v192_v51 = vsel %vm290_vm14, %v190_v50, 0.0 }
 0x181   :  { %193 = vst.msk [vmem:[%s313_s5] sm:$0xff] %vm26_vm2, %v192_v51 }

</bundles_post_ra>
